<compile_context>
chip_gen: v5e
topology: v5e:2x2
jax: 0.10.0
libtpu: 0.0.40
codegen_flags: <defaults>
</compile_context>

<pallas_src>
import functools

import jax
import jax.numpy as jnp
from jax.experimental import pallas as pl
from jax.experimental.pallas import tpu as pltpu

_MIB = 1024 * 1024


def line_layer_kernel(x_ref, z_ref, w_ref, bias_ref, y_ref, *, p):
    # x_ref: (TN, P)   z_ref: (TN, P*Z)   w_ref: (P*Z, 2P)   bias_ref: SMEM (2,)
    # Fused a/b projection on the MXU: columns [0, P) of `ab` hold a(z) for the
    # P original rows packed into each packed row, columns [P, 2P) hold b(z).
    ab = jnp.dot(z_ref[...], w_ref[...],
                 preferred_element_type=jnp.float32,
                 precision=jax.lax.Precision.HIGHEST)              # (TN, 2P)
    x = x_ref[...].astype(jnp.float32)
    # Fused epilogue: y = (a + bias_a) * x + (b + bias_b), no named temporaries.
    y = (ab[:, :p] + bias_ref[0]) * x + ab[:, p:] + bias_ref[1]
    y_ref[...] = y.astype(y_ref.dtype)


def _round_up(v, m):
    return ((v + m - 1) // m) * m


def _vmem_limit_bytes():
    """Scoped-VMEM limit derived from the chip's physical VMEM per TensorCore."""
    try:
        cap = int(pltpu.get_tpu_info().vmem_capacity_bytes)
    except Exception:
        cap = 0
    try:
        kind = str(getattr(jax.devices()[0], "device_kind", "")).lower()
    except Exception:
        kind = ""
    if any(s in kind for s in ("v7", "tpu7", "7x")):   # v7x: 64 MiB per TC
        cap = min(cap, 64 * _MIB) if cap > 0 else 64 * _MIB
    if cap <= 0:
        cap = 64 * _MIB           # conservative fallback (v7x-sized VMEM)
    return min(96 * _MIB, int(0.75 * cap))


def _num_tensorcores():
    """TensorCores per chip: 1 on v5e/v6e, otherwise assume 2 (megacore)."""
    try:
        kind = str(getattr(jax.devices()[0], "device_kind", "")).lower()
    except Exception:
        return 2
    if any(s in kind for s in ("v5e", "v5 lite", "v5lite",
                               "v6e", "v6 lite", "v6lite", "trillium")):
        return 1
    return 2


def _pick_block_rows(n_rows, z_width, xy_width, z_isz, x_isz, y_isz,
                     vmem_limit, num_cores):
    """Packed-row tile: as big as the lane-padding-aware VMEM budget allows, a
    multiple of the sublane tile, and - only on multi-TensorCore chips - small
    enough to give >= 2 grid steps per core so the pipeline keeps overlap."""
    LANE = 128

    def row_bytes(width, itemsize):          # VMEM pads the minor dim to 128
        return _round_up(max(width, 1), LANE) * itemsize

    # Double-buffered z / x / y blocks + f32 in-kernel temps (ab + epilogue).
    per_row = 2 * row_bytes(z_width, z_isz)
    per_row += 2 * row_bytes(xy_width, x_isz)
    per_row += 2 * row_bytes(xy_width, y_isz)
    per_row += 2 * row_bytes(2 * xy_width, 4)

    sub = max(8, 32 // max(1, min(z_isz, x_isz, y_isz)))
    budget = int(0.70 * vmem_limit)          # headroom: weights, metadata
    bn = max(sub, (budget // per_row) // sub * sub)

    if num_cores > 1:                        # keep >= 2 steps per TensorCore
        bn = min(bn, _round_up(pl.cdiv(n_rows, 2 * num_cores), sub))
    bn = min(bn, _round_up(n_rows, sub))     # never bigger than the problem
    return max(bn, sub)


def line_layer(x, z, wa, ba, wb, bb, *, block_rows=None):
    """x: (N, 1), z: (N, Z), wa/wb: (1, Z), ba/bb: (1, 1) -> y: (N, 1)."""
    N, one = x.shape
    assert one == 1, "x must have last dim 1"
    Z = z.shape[-1]
    assert z.shape[0] == N
    out_dtype = x.dtype

    # --- Free lane-dense repack: P original rows per packed row. -------------
    P = max(1, 128 // Z)                     # P*Z <= 128 (== 128 when Z | 128)
    n_pad = _round_up(N, P)
    if n_pad != N:                           # only ragged N pays this tiny pad
        x = jnp.pad(x, ((0, n_pad - N), (0, 0)))
        z = jnp.pad(z, ((0, n_pad - N), (0, 0)))
    n_rows = n_pad // P
    x_p = x.reshape(n_rows, P)               # row-major views
    z_p = z.reshape(n_rows, P * Z)

    # Fuse the two Linear(Z, 1) layers into one block-diagonal (P*Z, 2P) weight:
    # column j projects packed slot j onto a(z), column P+j onto b(z).
    eye = jnp.eye(P, dtype=wa.dtype)
    w_p = jnp.concatenate([jnp.kron(eye, wa.reshape(Z, 1)),
                           jnp.kron(eye, wb.reshape(Z, 1))], axis=1)
    bias = jnp.stack([jnp.reshape(ba, ()),
                      jnp.reshape(bb, ())]).astype(jnp.float32)      # (2,)

    vmem_limit = _vmem_limit_bytes()
    if block_rows is None:
        block_rows = _pick_block_rows(
            n_rows, P * Z, P,
            jnp.dtype(z.dtype).itemsize, jnp.dtype(x.dtype).itemsize,
            jnp.dtype(out_dtype).itemsize, vmem_limit, _num_tensorcores())

    grid = (pl.cdiv(n_rows, block_rows),)
    y_p = pl.pallas_call(
        functools.partial(line_layer_kernel, p=P),
        out_shape=jax.ShapeDtypeStruct((n_rows, P), out_dtype),
        grid_spec=pltpu.PrefetchScalarGridSpec(
            num_scalar_prefetch=0,
            grid=grid,
            in_specs=[
                pl.BlockSpec((block_rows, P), lambda i: (i, 0)),       # x (packed)
                pl.BlockSpec((block_rows, P * Z), lambda i: (i, 0)),   # z (dominant DMA)
                pl.BlockSpec((P * Z, 2 * P), lambda i: (0, 0)),        # fused weights (resident)
                pl.BlockSpec(memory_space=pltpu.MemorySpace.SMEM),     # fused bias scalars
            ],
            out_specs=pl.BlockSpec((block_rows, P), lambda i: (i, 0)),
        ),
        compiler_params=pltpu.CompilerParams(
            dimension_semantics=("parallel",),
            vmem_limit_bytes=vmem_limit,
        ),
    )(x_p, z_p, w_p, bias)

    y = y_p.reshape(n_pad, 1)
    return y if n_pad == N else y[:N]


if __name__ == "__main__":
    key = jax.random.PRNGKey(0)
    Z = 32   # z_size

    # Deterministic parameter init mimicking nn.Linear's default:
    # U(-1/sqrt(z_size), 1/sqrt(z_size)) for weights and biases.
    k_wa, k_ba, k_wb, k_bb = jax.random.split(key, 4)
    bound = 1.0 / jnp.sqrt(jnp.float32(Z))
    wa = jax.random.uniform(k_wa, (1, Z), jnp.float32, -bound, bound)
    ba = jax.random.uniform(k_ba, (1, 1), jnp.float32, -bound, bound)
    wb = jax.random.uniform(k_wb, (1, Z), jnp.float32, -bound, bound)
    bb = jax.random.uniform(k_bb, (1, 1), jnp.float32, -bound, bound)

    def reference(x, z):
        hi = jax.lax.Precision.HIGHEST
        a = jnp.dot(z, wa.T, precision=hi) + ba
        b = jnp.dot(z, wb.T, precision=hi) + bb
        return a * x + b

    # N=256 exercises a multi-step parallel grid over the packed layout;
    # N=19 exercises the padded / ragged tail (N not a multiple of the packing
    # factor or the sublane tile).
    for N in (256, 19):
        k_x, k_z = jax.random.split(jax.random.fold_in(key, N))
        x = jax.random.normal(k_x, (N, 1), jnp.float32)
        z = jax.random.normal(k_z, (N, Z), jnp.float32)

        y = jax.block_until_ready(line_layer(x, z, wa, ba, wb, bb))
        y_ref = reference(x, z)
        assert y.shape == (N, 1)
        assert jnp.allclose(y, y_ref, atol=1e-5, rtol=1e-5), (
            N, float(jnp.max(jnp.abs(y - y_ref))))

    print("KERNEL_OK")
</pallas_src>

<mosaic_0001>
module attributes {stable_mosaic.version = 11 : i64} {
  func.func @line_layer_kernel(%arg0: i32, %arg1: memref<16x4xf32, #tpu.memory_space<vmem>>, %arg2: memref<16x128xf32, #tpu.memory_space<vmem>>, %arg3: memref<128x8xf32, #tpu.memory_space<vmem>>, %arg4: memref<2xf32, #tpu.memory_space<smem>>, %arg5: memref<16x4xf32, #tpu.memory_space<vmem>>) attributes {dimension_semantics = [#tpu.dimension_semantics<parallel>], iteration_bounds = array<i64: 4>, scalar_prefetch = 0 : i64, scratch_operands = 0 : i64, tpu.core_type = #tpu.core_type<tc>, window_params = [{transform_indices = @transform_0, window_bounds = array<i64: 16, 4>}, {transform_indices = @transform_1, window_bounds = array<i64: 16, 128>}, {pipeline_mode = #tpu.pipeline_mode<synchronous>, transform_indices = @transform_2, window_bounds = array<i64: 128, 8>}, {transform_indices = @transform_3, window_bounds = array<i64: 2>}, {transform_indices = @transform_4, window_bounds = array<i64: 16, 4>}]} {
    %c0 = arith.constant 0 : index
    %c0_0 = arith.constant 0 : index
    %0 = vector.load %arg2[%c0, %c0_0] : memref<16x128xf32, #tpu.memory_space<vmem>>, vector<16x128xf32>
    %c0_1 = arith.constant 0 : index
    %c0_2 = arith.constant 0 : index
    %1 = vector.load %arg3[%c0_1, %c0_2] : memref<128x8xf32, #tpu.memory_space<vmem>>, vector<128x8xf32>
    %cst = arith.constant dense<0.000000e+00> : vector<16x8xf32>
    %2 = tpu.matmul %0, %1, %cst {dimension_numbers = #tpu.dot_dimension_numbers<[1], [0], [0], [1], [0, 0, 1, 1], [], []>, precision = #tpu.contract_precision<fp32>} : vector<16x128xf32>, vector<128x8xf32>, vector<16x8xf32> -> vector<16x8xf32>
    %c0_3 = arith.constant 0 : index
    %c0_4 = arith.constant 0 : index
    %3 = vector.load %arg1[%c0_3, %c0_4] : memref<16x4xf32, #tpu.memory_space<vmem>>, vector<16x4xf32>
    %4 = vector.extract_strided_slice %2 {offsets = [0, 0], sizes = [16, 4], strides = [1, 1]} : vector<16x8xf32> to vector<16x4xf32>
    %c0_5 = arith.constant 0 : index
    %5 = memref.load %arg4[%c0_5] : memref<2xf32, #tpu.memory_space<smem>>
    %6 = vector.broadcast %5 : f32 to vector<16x4xf32>
    %7 = arith.addf %4, %6 : vector<16x4xf32>
    %8 = arith.mulf %7, %3 : vector<16x4xf32>
    %9 = vector.extract_strided_slice %2 {offsets = [0, 4], sizes = [16, 4], strides = [1, 1]} : vector<16x8xf32> to vector<16x4xf32>
    %10 = arith.addf %8, %9 : vector<16x4xf32>
    %c1 = arith.constant 1 : index
    %11 = memref.load %arg4[%c1] : memref<2xf32, #tpu.memory_space<smem>>
    %12 = vector.broadcast %11 : f32 to vector<16x4xf32>
    %13 = arith.addf %10, %12 : vector<16x4xf32>
    %c0_6 = arith.constant 0 : index
    %c0_7 = arith.constant 0 : index
    %14 = vector.load %arg5[%c0_6, %c0_7] : memref<16x4xf32, #tpu.memory_space<vmem>>, vector<16x4xf32>
    tpu.vector_store %arg5[%c0_6, %c0_7], %13 {strides = array<i32>} : memref<16x4xf32, #tpu.memory_space<vmem>>, vector<16x4xf32>,
    return
  }
  func.func @transform_0(%arg0: i32) -> (i32, i32) {
    %c0_i32 = arith.constant 0 : i32
    %c0_i32_0 = arith.constant 0 : i32
    return %arg0, %c0_i32 : i32, i32
  }
  func.func @transform_1(%arg0: i32) -> (i32, i32) {
    %c0_i32 = arith.constant 0 : i32
    %c0_i32_0 = arith.constant 0 : i32
    return %arg0, %c0_i32 : i32, i32
  }
  func.func @transform_2(%arg0: i32) -> (i32, i32) {
    %c0_i32 = arith.constant 0 : i32
    %c0_i32_0 = arith.constant 0 : i32
    %c0_i32_1 = arith.constant 0 : i32
    return %c0_i32, %c0_i32_0 : i32, i32
  }
  func.func @transform_3(%arg0: i32) -> i32 {
    %c0_i32 = arith.constant 0 : i32
    %c0_i32_0 = arith.constant 0 : i32
    return %c0_i32 : i32
  }
  func.func @transform_4(%arg0: i32) -> (i32, i32) {
    %c0_i32 = arith.constant 0 : i32
    %c0_i32_0 = arith.constant 0 : i32
    return %arg0, %c0_i32 : i32, i32
  }
}

</mosaic_0001>

<bundles_post_ra>
// kernel: tpu_custom_call.1
= control target key start
LH: loop header
LB: loop body
LE: loop exit
PB: predicated region body
PF: predicated region fallthrough
CT: control target
= control target key end

     0   :  { %9 = vsyncpa [#allocation3], 0  ;;  %s854_s15 = smov 0   ;;  %s1153_s0 = inlined_call_operand.vmem [shape: f32[64,4], index: 0, kind: input, shape index: {}]   ;;  %s1154_s1 = inlined_call_operand.vmem [shape: f32[64,128], index: 1, kind: input, shape index: {}]   ;;  %s1155_s2 = inlined_call_operand.vmem [shape: f32[128,8], index: 2, kind: input, shape index: {}]   ;;  %s1156_s3 = inlined_call_operand.vmem [shape: f32[2], index: 3, kind: input, shape index: {}]   ;;  %s1157_s4 = inlined_call_operand.vmem [shape: f32[64,4], index: 4, kind: output, shape index: {}]  }
   0x1 LB: > { %s732_s16 = sadd.s32 4294967295, %s825_s15   ;;  %p734_p0 = scmp.ge.s32.totalorder %s825_s15, 1  ;;  %s825_s15 = sphi %s854_s15, %s15_s15  }
   0x2   : > { %p140_p1 = scmp.lt.s32.totalorder %s825_s15, 5  ;;  %s155_s19 = sshll.u32 %s1156_s3, 4  ;;  %s156_s19 = int_to_ptr.vmem [resolvable:$true] %s155_s19 }
   0x3   : > { %p788_p3 = scmp.eq.s32.totalorder %s732_s16, 0  ;;  %s827_s20 = smov [#allocation2]  }
   0x4   : > { %p141_p2 = pnand %p734_p0, %p140_p1 }
   0x6   : > { %p784_p4 = pneg %p141_p2  ;;  %186 = sbr.rel (%p141_p2) target bundleno = 348 (0x15c), region = 36 }
   0x8   : > { %p785_p5 = pnand %p788_p3, %p784_p4 }
   0xa   : > { %787 = dma.vmem_to_smem (!%p785_p5), %s156_s19, 16, %s827_s20, [#allocation3]  }
   0xb   : > { %820 = dma.done.wait (%p788_p3), [#allocation3], 16  }
   0xc   : > { %822 = vsyncadd (%p788_p3), [#allocation3], 4294967280 }
   0xd   : > { %193 = sfence }
   0xe   : > { %v254_v0 = vld [vmem:[%s1155_s2 + $0x78] sm:$0xff]  ;;  %v253_v1 = vld [vmem:[%s1155_s2 + $0x70] sm:$0xff]  ;;  %v252_v2 = vld [vmem:[%s1155_s2 + $0x68] sm:$0xff]  ;;  %s961_s21 = sshll.u32 %s732_s16, 1  ;;  %s828_s7 = smov 124   ;;  %vm649_vm0 = vcmask 31744  }
   0xf   : > { %v876_v3 = vand.u32 4294901760, %v254_v0  ;;  %v878_v4 = vand.u32 4294901760, %v253_v1  ;;  %v880_v5 = vand.u32 4294901760, %v252_v2  ;;  %v251_v6 = vld [vmem:[%s1155_s2 + $0x60] sm:$0xff]  ;;  %v250_v7 = vld [vmem:[%s1155_s2 + $0x58] sm:$0xff]  ;;  %v249_v8 = vld [vmem:[%s1155_s2 + $0x50] sm:$0xff] }
  0x10   : > { %v891_v9 = vand.u32 4294901760, %v251_v6  ;;  %v893_v10 = vand.u32 4294901760, %v250_v7  ;;  %v895_v11 = vand.u32 4294901760, %v249_v8  ;;  %v248_v12 = vld [vmem:[%s1155_s2 + $0x48] sm:$0xff]  ;;  %v247_v13 = vld [vmem:[%s1155_s2 + $0x40] sm:$0xff]  ;;  %v246_v18 = vld [vmem:[%s1155_s2 + $0x38] sm:$0xff] }
  0x11   : > { %256 = vmatpush.msra.mxu0 %v876_v3  ;;  %v305_v14 = vsub.f32 %v254_v0, %v876_v3  ;;  %v311_v15 = vsub.f32 %v253_v1, %v878_v4  ;;  %469 = vmatpush.msra.mxu3 %v876_v3  ;;  %v317_v16 = vsub.f32 %v252_v2, %v880_v5  ;;  %v908_v17 = vand.u32 4294901760, %v248_v12  ;;  %v245_v26 = vld [vmem:[%s1155_s2 + $0x30] sm:$0xff]  ;;  %v244_v36 = vld [vmem:[%s1155_s2 + $0x28] sm:$0xff]  ;;  %v243_v42 = vld [vmem:[%s1155_s2 + $0x20] sm:$0xff]  ;;  %p220_p6 = scmp.lt.s32.totalorder %s961_s21, 7  ;;  %s629_s8 = sld [smem:[#allocation2]] }
  0x12   : > { %v323_v19 = vsub.f32 %v251_v6, %v891_v9  ;;  %v329_v20 = vsub.f32 %v250_v7, %v893_v10  ;;  %v915_v21 = vand.u32 4294901760, %v247_v13  ;;  %v335_v25 = vsub.f32 %v249_v8, %v895_v11  ;;  %v242_v48 = vld [vmem:[%s1155_s2 + $0x18] sm:$0xff]  ;;  %v241_v54 = vld [vmem:[%s1155_s2 + $0x10] sm:$0xff]  ;;  %v240_v60 = vld [vmem:[%s1155_s2 + $0x8] sm:$0xff]  ;;  %s745_s9 = sld [smem:[#allocation2 + $0x1]] }
  0x13   : > { %258 = vmatpush.msra.mxu0 %v878_v4  ;;  %411 = vmatpush.msra.mxu2 %v305_v14  ;;  %v918_v22 = vand.u32 4294901760, %v305_v14  ;;  %v920_v23 = vand.u32 4294901760, %v311_v15  ;;  %v922_v24 = vand.u32 4294901760, %v317_v16  ;;  %v341_v28 = vsub.f32 %v248_v12, %v908_v17  ;;  %s1159_s21 = smov (!%p220_p6, %s961_s21), 7  ;;  %v239_v2 = vld [vmem:[%s1155_s2] sm:$0xff] }
  0x14   : > { %471 = vmatpush.msra.mxu3 %v878_v4  ;;  %v929_v27 = vand.u32 4294901760, %v323_v19  ;;  %v932_v29 = vand.u32 4294901760, %v246_v18  ;;  %v938_v33 = vand.u32 4294901760, %v329_v20  ;;  %v942_v34 = vsub.f32 %v247_v13, %v915_v21  ;;  %s1027_s29 = sshll.u32 %s1159_s21, 3 }
  0x15   : > { %260 = vmatpush.msra.mxu0 %v880_v5  ;;  %414 = vmatpush.msra.mxu2 %v311_v15  ;;  %v307_v30 = vsub.f32 %v305_v14, %v918_v22  ;;  %v313_v31 = vsub.f32 %v311_v15, %v920_v23  ;;  %v319_v32 = vsub.f32 %v317_v16, %v922_v24  ;;  %v944_v35 = vand.u32 4294901760, %v245_v26  ;;  %s1040_s6 = scalar_lea.vmem %s1154_s1, %s1027_s29  ;;  %s223_s12 = scalar_lea.vmem %s1153_s0, %s1027_s29 }
  0x16   : > { %473 = vmatpush.msra.mxu3 %v880_v5  ;;  %v325_v39 = vsub.f32 %v323_v19, %v929_v27  ;;  %v951_v40 = vand.u32 4294901760, %v335_v25  ;;  %v954_v41 = vand.u32 4294901760, %v341_v28  ;;  %v331_v44 = vsub.f32 %v329_v20, %v938_v33  ;;  %s235_s17 = scalar_lea.vmem %s1157_s4, %s1027_s29 }
  0x17   : > { %262 = vmatpush.msra.mxu0 %v891_v9  ;;  %417 = vmatpush.msra.mxu2 %v317_v16  ;;  %v308_v37 = vand.u32 4294901760, %v307_v30  ;;  %v314_v38 = vand.u32 4294901760, %v313_v31  ;;  %v320_v43 = vand.u32 4294901760, %v319_v32  ;;  %v353_v45 = vsub.f32 %v246_v18, %v932_v29 }
  0x18   : > { %475 = vmatpush.msra.mxu3 %v891_v9  ;;  %v966_v46 = vand.u32 4294901760, %v244_v36  ;;  %v970_v47 = vand.u32 4294901760, %v942_v34  ;;  %v326_v49 = vand.u32 4294901760, %v325_v39  ;;  %v337_v50 = vsub.f32 %v335_v25, %v951_v40 }
  0x19   : > { %264 = vmatpush.msra.mxu0 %v893_v10  ;;  %309 = vmatpush.msra.mxu1 %v308_v37  ;;  %v359_v51 = vsub.f32 %v245_v26, %v944_v35  ;;  %v978_v52 = vand.u32 4294901760, %v243_v42  ;;  %v343_v53 = vsub.f32 %v341_v28, %v954_v41  ;;  %v332_v55 = vand.u32 4294901760, %v331_v44 }
  0x1a   : > { %420 = vmatpush.msra.mxu2 %v323_v19  ;;  %477 = vmatpush.msra.mxu3 %v893_v10  ;;  %v365_v56 = vsub.f32 %v244_v36, %v966_v46  ;;  %v988_v57 = vand.u32 4294901760, %v242_v48  ;;  %v990_v58 = vand.u32 4294901760, %v353_v45  ;;  %v349_v59 = vsub.f32 %v942_v34, %v970_v47 }
  0x1b   : > { %266 = vmatpush.msra.mxu0 %v895_v11  ;;  %315 = vmatpush.msra.mxu1 %v314_v38  ;;  %v338_v61 = vand.u32 4294901760, %v337_v50  ;;  %v371_v62 = vsub.f32 %v243_v42, %v978_v52  ;;  %v1000_v63 = vand.u32 4294901760, %v241_v54  ;;  %v1002_v0 = vand.u32 4294901760, %v359_v51  ;;  %v237_v38 = vld [vmem:[%s1040_s6] sm:$0xff] }
  0x1c   : > { %423 = vmatpush.msra.mxu2 %v329_v20  ;;  %479 = vmatpush.msra.mxu3 %v895_v11  ;;  %v344_v1 = vand.u32 4294901760, %v343_v53  ;;  %v355_v6 = vsub.f32 %v353_v45, %v990_v58  ;;  %v377_v7 = vsub.f32 %v242_v48, %v988_v57  ;;  %v1014_v8 = vand.u32 4294901760, %v240_v60 }
  0x1d   : > { %268 = vmatpush.msra.mxu0 %v908_v17  ;;  %321 = vmatpush.msra.mxu1 %v320_v43  ;;  %v1016_v12 = vand.u32 4294901760, %v365_v56  ;;  %v350_v13 = vand.u32 4294901760, %v349_v59  ;;  %v361_v14 = vsub.f32 %v359_v51, %v1002_v0  ;;  %v383_v15 = vsub.f32 %v241_v54, %v1000_v63 }
  0x1e   : > { %426 = vmatpush.msra.mxu2 %v335_v25  ;;  %481 = vmatpush.msra.mxu3 %v908_v17  ;;  %v1023_v16 = vand.u32 4294901760, %v239_v2  ;;  %v1025_v18 = vand.u32 4294901760, %v371_v62  ;;  %v356_v19 = vand.u32 4294901760, %v355_v6  ;;  %v389_v25 = vsub.f32 %v240_v60, %v1014_v8 }
  0x1f   : > { %270 = vmatpush.msra.mxu0 %v915_v21  ;;  %327 = vmatpush.msra.mxu1 %v326_v49  ;;  %v367_v20 = vsub.f32 %v365_v56, %v1016_v12  ;;  %v1033_v26 = vand.u32 4294901760, %v377_v7  ;;  %v1045_v32 = vand.u32 4294901760, %v383_v15  ;;  %v1059_v44 = vand.u32 4294901760, %v237_v38 }
  0x20   : > { %429 = vmatpush.msra.mxu2 %v341_v28  ;;  %483 = vmatpush.msra.mxu3 %v915_v21  ;;  %v362_v28 = vand.u32 4294901760, %v361_v14  ;;  %v373_v30 = vsub.f32 %v371_v62, %v1025_v18  ;;  %v395_v31 = vsub.f32 %v239_v2, %v1023_v16  ;;  %v1050_v37 = vand.u32 4294901760, %v389_v25 }
  0x21   : > { %272 = vmatpush.msra.mxu0 %v932_v29  ;;  %333 = vmatpush.msra.mxu1 %v332_v55  ;;  %v379_v36 = vsub.f32 %v377_v7, %v1033_v26  ;;  %v385_v42 = vsub.f32 %v383_v15, %v1045_v32  ;;  %v238_v55 = vld [vmem:[%s1040_s6 + $0x8] sm:$0xff]  ;;  %v630_v2 = vstv %s629_s8 }
  0x22   : > { %432 = vmatpush.msra.mxu2 %v942_v34  ;;  %485 = vmatpush.msra.mxu3 %v932_v29  ;;  %v368_v34 = vand.u32 4294901760, %v367_v20  ;;  %v374_v39 = vand.u32 4294901760, %v373_v30  ;;  %v1056_v43 = vand.u32 4294901760, %v395_v31  ;;  %v391_v48 = vsub.f32 %v389_v25, %v1050_v37 }
  0x23   : > { %274 = vmatpush.msra.mxu0 %v944_v35  ;;  %339 = vmatpush.msra.mxu1 %v338_v61  ;;  %v386_v49 = vand.u32 4294901760, %v385_v42  ;;  %v1077_v59 = vand.u32 4294901760, %v238_v55 }
  0x24   : > { %435 = vmatpush.msra.mxu2 %v353_v45  ;;  %487 = vmatpush.msra.mxu3 %v944_v35  ;;  %v380_v45 = vand.u32 4294901760, %v379_v36  ;;  %v397_v50 = vsub.f32 %v395_v31, %v1056_v43  ;;  %v392_v53 = vand.u32 4294901760, %v391_v48 }
  0x25   : > { %276 = vmatpush.msra.mxu0 %v966_v46  ;;  %345 = vmatpush.msra.mxu1 %v344_v1 }
  0x26   : > { %438 = vmatpush.msra.mxu2 %v359_v51  ;;  %489 = vmatpush.msra.mxu3 %v966_v46  ;;  %v288_v51 = vsub.f32 %v237_v38, %v1059_v44  ;;  %v398_v54 = vand.u32 4294901760, %v397_v50 }
  0x27   : > { %278 = vmatpush.msra.mxu0 %v978_v52  ;;  %351 = vmatpush.msra.mxu1 %v350_v13 }
  0x28   : > { %441 = vmatpush.msra.mxu2 %v365_v56  ;;  %491 = vmatpush.msra.mxu3 %v978_v52  ;;  %v289_v56 = vand.u32 4294901760, %v288_v51 }
  0x29   : > { %280 = vmatpush.msra.mxu0 %v988_v57  ;;  %357 = vmatpush.msra.mxu1 %v356_v19 }
  0x2a   : > { %444 = vmatpush.msra.mxu2 %v371_v62  ;;  %493 = vmatpush.msra.mxu3 %v988_v57 }
  0x2b   : > { %282 = vmatpush.msra.mxu0 %v1000_v63  ;;  %363 = vmatpush.msra.mxu1 %v362_v28 }
  0x2c   : > { %447 = vmatpush.msra.mxu2 %v377_v7  ;;  %495 = vmatpush.msra.mxu3 %v1000_v63  ;;  %v627_v7 = vld [vmem:[%s223_s12] sm:$0xff] }
  0x2d   : > { %284 = vmatpush.msra.mxu0 %v1014_v8  ;;  %369 = vmatpush.msra.mxu1 %v368_v34 }
  0x2e   : > { %450 = vmatpush.msra.mxu2 %v383_v15  ;;  %497 = vmatpush.msra.mxu3 %v1014_v8 }
  0x2f   : > { %286 = vmatpush.msra.mxu0 %v1023_v16  ;;  %375 = vmatpush.msra.mxu1 %v374_v39 }
  0x30   : > { %453 = vmatpush.msra.mxu2 %v389_v25  ;;  %499 = vmatpush.msra.mxu3 %v1023_v16 }
  0x31   : > { %516 = vmatpush.msrb.mxu0 %v918_v22  ;;  %381 = vmatpush.msra.mxu1 %v380_v45 }
  0x32   : > { %456 = vmatpush.msra.mxu2 %v395_v31  ;;  %764 = vmatpush.msrb.mxu3 %v876_v3 }
  0x33   : > { %520 = vmatpush.msrb.mxu0 %v920_v23  ;;  %387 = vmatpush.msra.mxu1 %v386_v49 }
  0x34   : > { %748 = vmatpush.msrb.mxu2 %v918_v22  ;;  %765 = vmatpush.msrb.mxu3 %v878_v4  ;;  %v290_v22 = vsub.f32 %v288_v51, %v289_v56 }
  0x35   : > { %524 = vmatpush.msrb.mxu0 %v922_v24  ;;  %393 = vmatpush.msra.mxu1 %v392_v53 }
  0x36   : > { %749 = vmatpush.msrb.mxu2 %v920_v23  ;;  %766 = vmatpush.msrb.mxu3 %v880_v5  ;;  %v296_v23 = vsub.f32 %v238_v55, %v1077_v59 }
  0x37   : > { %528 = vmatpush.msrb.mxu0 %v929_v27  ;;  %399 = vmatpush.msra.mxu1 %v398_v54 }
  0x38   : > { %750 = vmatpush.msrb.mxu2 %v922_v24  ;;  %767 = vmatpush.msrb.mxu3 %v891_v9 }
  0x39   : > { %532 = vmatpush.msrb.mxu0 %v938_v33  ;;  %587 = vmatpush.msrb.mxu1 %v876_v3  ;;  %v291_v3 = vand.u32 4294901760, %v290_v22 }
  0x3a   : > { %751 = vmatpush.msrb.mxu2 %v929_v27  ;;  %768 = vmatpush.msrb.mxu3 %v893_v10 }
  0x3b   : > { %536 = vmatpush.msrb.mxu0 %v951_v40  ;;  %589 = vmatpush.msrb.mxu1 %v878_v4  ;;  %v297_v4 = vand.u32 4294901760, %v296_v23 }
  0x3c   : > { %752 = vmatpush.msrb.mxu2 %v938_v33  ;;  %769 = vmatpush.msrb.mxu3 %v895_v11 }
  0x3d   : > { %540 = vmatpush.msrb.mxu0 %v954_v41  ;;  %591 = vmatpush.msrb.mxu1 %v880_v5  ;;  %v298_v5 = vsub.f32 %v296_v23, %v297_v4 }
  0x3e   : > { %753 = vmatpush.msrb.mxu2 %v951_v40  ;;  %292 = vmatmul.f32.vlgmr.msra.gmra.mxu0 %v291_v3 }
  0x3f   : > { %544 = vmatpush.msrb.mxu0 %v970_v47  ;;  %593 = vmatpush.msrb.mxu1 %v891_v9  ;;  %v299_v9 = vand.u32 4294901760, %v298_v5 }
  0x40   : > { %754 = vmatpush.msrb.mxu2 %v954_v41  ;;  %770 = vmatpush.msrb.mxu3 %v908_v17 }
  0x41   : > { %595 = vmatpush.msrb.mxu1 %v893_v10  ;;  %548 = vmatpush.msrb.mxu0 %v990_v58 }
  0x42   : > { %755 = vmatpush.msrb.mxu2 %v970_v47  ;;  %771 = vmatpush.msrb.mxu3 %v915_v21 }
  0x43   : > { %459 = vmatmul.f32.vlgmr.msra.gmra.mxu2 %v288_v51  ;;  %552 = vmatpush.msrb.mxu0 %v1002_v0 }
  0x44   : > { %756 = vmatpush.msrb.mxu2 %v990_v58  ;;  %597 = vmatpush.msrb.mxu1 %v895_v11 }
  0x45   : > { %503 = vmatmul.f32.vlgmr.msra.gmra.mxu3 %v289_v56  ;;  %556 = vmatpush.msrb.mxu0 %v1016_v12 }
  0x46   : > { %757 = vmatpush.msrb.mxu2 %v1002_v0  ;;  %599 = vmatpush.msrb.mxu1 %v908_v17 }
  0x47   : > { %772 = vmatpush.msrb.mxu3 %v932_v29  ;;  %401 = vmatmul.f32.vlgmr.msra.gmra.mxu1 %v1059_v44 }
  0x48   : > { %758 = vmatpush.msrb.mxu2 %v1016_v12  ;;  %560 = vmatpush.msrb.mxu0 %v1025_v18  ;;  %v646_v12 = vstv %s745_s9 }
  0x49   : > { %601 = vmatpush.msrb.mxu1 %v915_v21  ;;  %773 = vmatpush.msrb.mxu3 %v944_v35 }
  0x4a   : > { %300 = vmatmul.f32.gmra.mxu0 %v299_v9  ;;  %759 = vmatpush.msrb.mxu2 %v1025_v18  ;;  %v628_v18 = vld [vmem:[%s223_s12 + $0x8] sm:$0xff] }
  0x4b   : > { %564 = vmatpush.msrb.mxu0 %v1033_v26  ;;  %603 = vmatpush.msrb.mxu1 %v932_v29 }
  0x4c   : > { %774 = vmatpush.msrb.mxu3 %v966_v46  ;;  %464 = vmatmul.f32.gmra.mxu2 %v296_v23 }
  0x4d   : > { %760 = vmatpush.msrb.mxu2 %v1033_v26  ;;  %568 = vmatpush.msrb.mxu0 %v1045_v32 }
  0x4e   : > { %605 = vmatpush.msrb.mxu1 %v944_v35  ;;  %775 = vmatpush.msrb.mxu3 %v978_v52 }
  0x4f   : > { %509 = vmatmul.f32.gmra.mxu3 %v297_v4  ;;  %761 = vmatpush.msrb.mxu2 %v1045_v32 }
  0x50   : > { %572 = vmatpush.msrb.mxu0 %v1050_v37  ;;  %607 = vmatpush.msrb.mxu1 %v966_v46 }
  0x51   : > { %776 = vmatpush.msrb.mxu3 %v988_v57  ;;  %405 = vmatmul.f32.gmra.mxu1 %v1077_v59 }
  0x52   : > { %762 = vmatpush.msrb.mxu2 %v1050_v37  ;;  %576 = vmatpush.msrb.mxu0 %v1056_v43 }
  0x53   : > { %609 = vmatpush.msrb.mxu1 %v978_v52  ;;  %777 = vmatpush.msrb.mxu3 %v1000_v63 }
  0x54   : > { %578 = vmatmul.f32.vlgmr.msrb.gmra.mxu0 %v1059_v44  ;;  %763 = vmatpush.msrb.mxu2 %v1056_v43 }
  0x55   : > { %611 = vmatpush.msrb.mxu1 %v988_v57  ;;  %778 = vmatpush.msrb.mxu3 %v1014_v8 }
  0x56   : > { %582 = vmatmul.f32.vlgmr.msrb.gmra.mxu2 %v1077_v59 }
  0x57   : > { %613 = vmatpush.msrb.mxu1 %v1000_v63  ;;  %779 = vmatpush.msrb.mxu3 %v1023_v16 }
  0x58   : > { %623 = vmatmul.f32.vlgmr.msrb.gmra.mxu3 %v1077_v59 }
  0x59   : > { %615 = vmatpush.msrb.mxu1 %v1014_v8 }
  0x5b   : > { %617 = vmatpush.msrb.mxu1 %v1023_v16 }
  0x5c   : > { %619 = vmatmul.f32.vlgmr.msrb.gmra.mxu1 %v1059_v44 }
  0xbb   : > { %v293_v10 = vpop.f32.mrf.mxu0 }
  0xc4   : > { %v402_v11 = vpop.f32.mrf.mxu1 }
  0xc5   : > { %v403_v27 = vadd.f32 %v402_v11, %v293_v10 }
  0xc6   : > { %v460_v17 = vpop.f32.mrf.mxu2 }
  0xc7   : > { %v301_v21 = vpop.f32.mrf.mxu0  ;;  %v461_v35 = vadd.f32 %v460_v17, %v403_v27 }
  0xc8   : > { %v504_v24 = vpop.f32.mrf.mxu3 }
  0xc9   : > { %v505_v47 = vadd.f32 %v504_v24, %v461_v35 }
  0xce   : > { %v406_v29 = vpop.f32.mrf.mxu1 }
  0xcf   : > { %v465_v33 = vpop.f32.mrf.mxu2  ;;  %v407_v40 = vadd.f32 %v406_v29, %v301_v21 }
  0xd1   : > { %v579_v41 = vpop.f32.mrf.mxu0  ;;  %v466_v52 = vadd.f32 %v465_v33, %v407_v40 }
  0xd2   : > { %v510_v46 = vpop.f32.mrf.mxu3  ;;  %v580_v57 = vadd.f32 %v579_v41, %v505_v47 }
  0xd3   : > { %v511_v62 = vadd.f32 %v510_v46, %v466_v52 }
  0xd9   : > { %v620_v58 = vpop.f32.mrf.mxu1  ;;  %v583_v61 = vpop.f32.mrf.mxu2 }
  0xda   : > { %v621_v60 = vadd.f32 %v620_v58, %v580_v57  ;;  %v584_v63 = vadd.f32 %v583_v61, %v511_v62 }
  0xdb   : > { %v624_v0 = vpop.f32.mrf.mxu3 }
  0xdc   : > { %637 = vrot.lane.b32.xlu0 %v621_v60, %s828_s7  ;;  %v625_v1 = vadd.f32 %v624_v0, %v584_v63  ;;  %v631_v6 = vadd.f32 %v630_v2, %v621_v60 }
  0xde   : > { %v633_v8 = vmul.f32 %v631_v6, %v627_v7  ;;  %v632_v15 = vadd.f32 %v630_v2, %v625_v1 }
  0xe0   : > { %v634_v19 = vmul.f32 %v632_v15, %v628_v18 }
  0xe4   : > { %639 = vrot.lane.b32.xlu0 %v625_v1, %s828_s7 }
 0x14e   : > { %v638_v13 = vpop.permute.xlu0 %637 }
 0x14f   : > { %v643_v14 = vadd.f32 %v638_v13, %v633_v8 }
 0x151   : > { %v647_v16 = vadd.f32 %v646_v12, %v643_v14 }
 0x153   : > { %650 = vst.msk [vmem:[%s235_s17] sm:$0xff] %vm649_vm0, %v647_v16 }
 0x156   : > { %v640_v20 = vpop.permute.xlu0 %639 }
 0x157   : > { %v644_v25 = vadd.f32 %v640_v20, %v634_v19 }
 0x159   : > { %v648_v26 = vadd.f32 %v646_v12, %v644_v25 }
 0x15b   : > { %651 = vst.msk [vmem:[%s235_s17 + $0x8] sm:$0xff] %vm649_vm0, %v648_v26 }
 0x15c PF: > { %s15_s15 = sadd.s32 1, %s825_s15  }
 0x15d   : > { %p12_p7 = scmp.ge.s32.totalorder %s15_s15, 6  }
 0x15f   :  { %14 = sbr.rel (!%p12_p7) target bundleno = 1 (0x1), region = 74 }
 0x164   :  { %674 = vsyncpa [#allocation3], 1 }
 0x165   :  { %676 = vsyncpa [#allocation3 + $0x1], 1 }

</bundles_post_ra>
